<compile_context>
chip_gen: v5e
topology: v5e:2x2
jax: 0.10.0
libtpu: 0.0.40
codegen_flags: <defaults>
</compile_context>

<pallas_src>
import jax
import jax.numpy as jnp
from jax.experimental import pallas as pl
from jax.experimental.pallas import tpu as pltpu

HIDDEN = 128


def _round_up(n, m):
    return ((n + m - 1) // m) * m


# ---------------------------------------------------------------------------
# Kernel
# ---------------------------------------------------------------------------
def mlp_v2_kernel(
    x_ref,              # (TILE_B, D_in)   f32  (cast to bf16 in-kernel)
    w1_ref, b1_ref,     # (D_in, 128) bf16, (1, 128) f32 (BN folded)
    w2_ref, b2_ref,     # (128, 128)  bf16, (1, 128) f32
    w3_ref, b3_ref,     # (128, 128)  bf16, (1, 128) f32
    w4_ref,             # (128, 1)    bf16
    b4_ref,             # (1, 1)      f32 in SMEM (scalar)
    o_ref,              # (TILE_B, 1) f32
):
    # In-kernel downcast: x is read from HBM exactly once, as f32.
    x = x_ref[...].astype(jnp.bfloat16)

    # block 1: Linear + folded BN + ReLU
    h = jnp.dot(x, w1_ref[...], preferred_element_type=jnp.float32) + b1_ref[...]
    h = jnp.maximum(h, 0.0).astype(jnp.bfloat16)

    # block 2
    h = jnp.dot(h, w2_ref[...], preferred_element_type=jnp.float32) + b2_ref[...]
    h = jnp.maximum(h, 0.0).astype(jnp.bfloat16)

    # block 3
    h = jnp.dot(h, w3_ref[...], preferred_element_type=jnp.float32) + b3_ref[...]
    h = jnp.maximum(h, 0.0).astype(jnp.bfloat16)

    # head: Linear(128 -> 1) + Dropout (eval: identity) + Sigmoid.
    # (tile_b,128) x (128,1) is MXU-natural — no transpose of h needed.
    logits = jnp.dot(h, w4_ref[...], preferred_element_type=jnp.float32) + b4_ref[0, 0]
    o_ref[...] = jax.nn.sigmoid(logits)


# ---------------------------------------------------------------------------
# Wrapper
# ---------------------------------------------------------------------------
def _vmem_budget_bytes(tile_b, input_size):
    """Size the scoped VMEM limit from actual buffers (+50% headroom)."""
    w_bytes = 2 * (  # default double-buffering on resident blocks
        (input_size * HIDDEN + 2 * HIDDEN * HIDDEN + HIDDEN) * 2   # bf16 weights
        + 3 * HIDDEN * 4                                           # f32 biases
    )
    x_bytes = 2 * tile_b * input_size * 4                          # f32 x dbl-buf
    act_bytes = tile_b * (input_size * 2 + HIDDEN * (4 + 2 + 4))   # bf16 x, f32 acc, bf16 h
    out_bytes = 2 * tile_b * 4
    budget = int(1.5 * (w_bytes + x_bytes + act_bytes + out_bytes)) + (2 << 20)
    return min(budget, 48 << 20)                                   # fits v7x 64 MiB


def mlp_v2_forward(x, params, *, tile_b=4096):
    """x: [B, input_size] f32 -> [B] f32 (matches output.view(-1)).

    tile_b: batch tile. Default 4096; sweep 2048/4096/8192 (keep a multiple of
    256 for full MXU cadence). It is shrunk automatically for small batches and
    capped so that large batches get >= 2 grid steps (v7x dual-TC sharding).
    """
    B, input_size = x.shape
    assert x.dtype == jnp.float32

    # Shrink the tile for small batches (sublane multiple of 8).
    tile_b = max(8, min(tile_b, _round_up(B, 8)))
    # For large batches, keep >= 2 grid steps so both v7x TensorCores get work.
    if B > 512:
        tile_b = min(tile_b, max(256, _round_up(pl.cdiv(B, 2), 256)))

    num_steps = pl.cdiv(B, tile_b)          # ragged last block: no jnp.pad copy
    b_pad = num_steps * tile_b

    def _resident(shape):
        # Weight/bias blocks: whole array, same block every grid step
        # (fetched once, stays VMEM-resident).
        return pl.BlockSpec(shape, lambda i: (0, 0))

    in_specs = [
        pl.BlockSpec((tile_b, input_size), lambda i: (i, 0)),       # x tile (f32)
        _resident((input_size, HIDDEN)), _resident((1, HIDDEN)),    # w1', b1'
        _resident((HIDDEN, HIDDEN)),     _resident((1, HIDDEN)),    # w2', b2'
        _resident((HIDDEN, HIDDEN)),     _resident((1, HIDDEN)),    # w3', b3'
        _resident((HIDDEN, 1)),                                     # w4
        pl.BlockSpec(memory_space=pltpu.MemorySpace.SMEM),          # b4 scalar
    ]
    out_specs = pl.BlockSpec((tile_b, 1), lambda i: (i, 0))

    out = pl.pallas_call(
        mlp_v2_kernel,
        grid=(num_steps,),
        in_specs=in_specs,
        out_specs=out_specs,
        out_shape=jax.ShapeDtypeStruct((b_pad, 1), jnp.float32),
        compiler_params=pltpu.CompilerParams(
            dimension_semantics=("parallel",),
            vmem_limit_bytes=_vmem_budget_bytes(tile_b, input_size),
        ),
    )(
        x,
        params["w1"], params["b1"],
        params["w2"], params["b2"],
        params["w3"], params["b3"],
        params["w4"], params["b4"],
    )
    return out.reshape(-1)[:B]


# ---------------------------------------------------------------------------
# Parameters
# ---------------------------------------------------------------------------
def make_params(key, input_size, hidden=HIDDEN, eps=1e-5):
    """Deterministic synthetic parameters matching MLP_V2's shapes.

    Linear weights stored as [D_in, D_out] (transposed vs PyTorch).
    BatchNorm1d inference params are expressed as per-feature (scale, shift).
    """
    keys = jax.random.split(key, 20)
    p = {}

    def lin(kw, kb, din, dout):
        bound = 1.0 / jnp.sqrt(din)
        w = jax.random.uniform(kw, (din, dout), jnp.float32, -bound, bound)
        b = jax.random.uniform(kb, (1, dout), jnp.float32, -bound, bound)
        return w, b

    def bn(kg, kb, km, kv, d):
        gamma = 1.0 + 0.1 * jax.random.normal(kg, (1, d), jnp.float32)
        beta = 0.1 * jax.random.normal(kb, (1, d), jnp.float32)
        mean = 0.1 * jax.random.normal(km, (1, d), jnp.float32)
        var = jnp.abs(1.0 + 0.1 * jax.random.normal(kv, (1, d), jnp.float32))
        scale = gamma / jnp.sqrt(var + eps)
        shift = beta - mean * scale
        return scale, shift

    p["w1"], p["b1"] = lin(keys[0], keys[1], input_size, hidden)
    p["s1"], p["t1"] = bn(keys[2], keys[3], keys[4], keys[5], hidden)
    p["w2"], p["b2"] = lin(keys[6], keys[7], hidden, hidden)
    p["s2"], p["t2"] = bn(keys[8], keys[9], keys[10], keys[11], hidden)
    p["w3"], p["b3"] = lin(keys[12], keys[13], hidden, hidden)
    p["s3"], p["t3"] = bn(keys[14], keys[15], keys[16], keys[17], hidden)

    # head Linear(128 -> 1); weight stored as [128, 1] column, bias [1, 1].
    bound = 1.0 / jnp.sqrt(hidden)
    p["w4"] = jax.random.uniform(keys[18], (hidden, 1), jnp.float32, -bound, bound)
    p["b4"] = jax.random.uniform(keys[19], (1, 1), jnp.float32, -bound, bound)
    return p


def fold_params(p):
    """Fold eval-mode BN affine into the preceding Linear; cast weights to bf16."""
    f = {}
    for l in (1, 2, 3):
        w, b = p[f"w{l}"], p[f"b{l}"]
        s, t = p[f"s{l}"], p[f"t{l}"]
        f[f"w{l}"] = (w * s).astype(jnp.bfloat16)            # scale output columns
        f[f"b{l}"] = (b * s + t).astype(jnp.float32)         # (1, 128)
    f["w4"] = p["w4"].astype(jnp.bfloat16)                   # (128, 1)
    f["b4"] = p["b4"].astype(jnp.float32)                    # (1, 1) SMEM scalar
    return f


# ---------------------------------------------------------------------------
# References
# ---------------------------------------------------------------------------
def reference_forward_bf16(x, fp):
    """Pure-JAX mirror of the kernel's numerics (bf16 matmuls, f32 accum)."""
    h = x.astype(jnp.bfloat16)
    h = jnp.dot(h, fp["w1"], preferred_element_type=jnp.float32) + fp["b1"]
    h = jnp.maximum(h, 0.0).astype(jnp.bfloat16)
    h = jnp.dot(h, fp["w2"], preferred_element_type=jnp.float32) + fp["b2"]
    h = jnp.maximum(h, 0.0).astype(jnp.bfloat16)
    h = jnp.dot(h, fp["w3"], preferred_element_type=jnp.float32) + fp["b3"]
    h = jnp.maximum(h, 0.0).astype(jnp.bfloat16)
    logits = jnp.dot(h, fp["w4"], preferred_element_type=jnp.float32) + fp["b4"][0, 0]
    return jax.nn.sigmoid(logits).reshape(-1)


def reference_forward_f32(x, p):
    """Full-precision eval-mode forward (unfolded BN) for semantic sanity."""
    h = jnp.maximum((x @ p["w1"] + p["b1"]) * p["s1"] + p["t1"], 0.0)
    h = jnp.maximum((h @ p["w2"] + p["b2"]) * p["s2"] + p["t2"], 0.0)
    h = jnp.maximum((h @ p["w3"] + p["b3"]) * p["s3"] + p["t3"], 0.0)
    logits = (h @ p["w4"]).reshape(-1) + p["b4"][0, 0]
    return jax.nn.sigmoid(logits)


# ---------------------------------------------------------------------------
if __name__ == "__main__":
    INPUT_SIZE = 32
    BATCH = 8

    key = jax.random.PRNGKey(0)
    k_x, k_p = jax.random.split(key)

    x = jax.random.normal(k_x, (BATCH, INPUT_SIZE), jnp.float32)
    raw = make_params(k_p, INPUT_SIZE)
    params = fold_params(raw)

    out = mlp_v2_forward(x, params)
    out = jax.block_until_ready(out)

    ref_bf16 = reference_forward_bf16(x, params)
    ref_f32 = reference_forward_f32(x, raw)

    assert out.shape == (BATCH,), f"bad output shape {out.shape}"
    assert jnp.allclose(out, ref_bf16, atol=2e-3, rtol=2e-3), "mismatch vs bf16 reference"
    assert jnp.allclose(out, ref_f32, atol=3e-2, rtol=3e-2), "mismatch vs f32 reference"

    print("KERNEL_OK")
</pallas_src>

<mosaic_0001>
module attributes {stable_mosaic.version = 11 : i64} {
  func.func @mlp_v2_kernel(%arg0: i32, %arg1: memref<8x32xf32, #tpu.memory_space<vmem>>, %arg2: memref<32x128xbf16, #tpu.memory_space<vmem>>, %arg3: memref<1x128xf32, #tpu.memory_space<vmem>>, %arg4: memref<128x128xbf16, #tpu.memory_space<vmem>>, %arg5: memref<1x128xf32, #tpu.memory_space<vmem>>, %arg6: memref<128x128xbf16, #tpu.memory_space<vmem>>, %arg7: memref<1x128xf32, #tpu.memory_space<vmem>>, %arg8: memref<128x1xbf16, #tpu.memory_space<vmem>>, %arg9: memref<1x1xf32, #tpu.memory_space<smem>>, %arg10: memref<8x1xf32, #tpu.memory_space<vmem>>) attributes {dimension_semantics = [#tpu.dimension_semantics<parallel>], iteration_bounds = array<i64: 1>, scalar_prefetch = 0 : i64, scratch_operands = 0 : i64, tpu.core_type = #tpu.core_type<tc>, window_params = [{transform_indices = @transform_0, window_bounds = array<i64: 8, 32>}, {pipeline_mode = #tpu.pipeline_mode<synchronous>, transform_indices = @transform_1, window_bounds = array<i64: 32, 128>}, {pipeline_mode = #tpu.pipeline_mode<synchronous>, transform_indices = @transform_2, window_bounds = array<i64: 1, 128>}, {pipeline_mode = #tpu.pipeline_mode<synchronous>, transform_indices = @transform_3, window_bounds = array<i64: 128, 128>}, {pipeline_mode = #tpu.pipeline_mode<synchronous>, transform_indices = @transform_4, window_bounds = array<i64: 1, 128>}, {pipeline_mode = #tpu.pipeline_mode<synchronous>, transform_indices = @transform_5, window_bounds = array<i64: 128, 128>}, {pipeline_mode = #tpu.pipeline_mode<synchronous>, transform_indices = @transform_6, window_bounds = array<i64: 1, 128>}, {pipeline_mode = #tpu.pipeline_mode<synchronous>, transform_indices = @transform_7, window_bounds = array<i64: 128, 1>}, {transform_indices = @transform_8, window_bounds = array<i64: 1, 1>}, {transform_indices = @transform_9, window_bounds = array<i64: 8, 1>}]} {
    %c0 = arith.constant 0 : index
    %c0_0 = arith.constant 0 : index
    %0 = vector.load %arg1[%c0, %c0_0] : memref<8x32xf32, #tpu.memory_space<vmem>>, vector<8x32xf32>
    %1 = arith.truncf %0 : vector<8x32xf32> to vector<8x32xbf16>
    %c0_1 = arith.constant 0 : index
    %c0_2 = arith.constant 0 : index
    %2 = vector.load %arg2[%c0_1, %c0_2] : memref<32x128xbf16, #tpu.memory_space<vmem>>, vector<32x128xbf16>
    %cst = arith.constant dense<0.000000e+00> : vector<8x128xf32>
    %3 = tpu.matmul %1, %2, %cst {dimension_numbers = #tpu.dot_dimension_numbers<[1], [0], [0], [1], [0, 0, 1, 1], [], []>} : vector<8x32xbf16>, vector<32x128xbf16>, vector<8x128xf32> -> vector<8x128xf32>
    %c0_3 = arith.constant 0 : index
    %c0_4 = arith.constant 0 : index
    %4 = vector.load %arg3[%c0_3, %c0_4] : memref<1x128xf32, #tpu.memory_space<vmem>>, vector<1x128xf32>
    %5 = vector.broadcast %4 : vector<1x128xf32> to vector<8x128xf32>
    %6 = arith.addf %3, %5 : vector<8x128xf32>
    %cst_5 = arith.constant 0.000000e+00 : f32
    %7 = vector.broadcast %cst_5 : f32 to vector<8x128xf32>
    %8 = arith.maximumf %6, %7 : vector<8x128xf32>
    %9 = arith.truncf %8 : vector<8x128xf32> to vector<8x128xbf16>
    %c0_6 = arith.constant 0 : index
    %c0_7 = arith.constant 0 : index
    %10 = vector.load %arg4[%c0_6, %c0_7] : memref<128x128xbf16, #tpu.memory_space<vmem>>, vector<128x128xbf16>
    %cst_8 = arith.constant dense<0.000000e+00> : vector<8x128xf32>
    %11 = tpu.matmul %9, %10, %cst_8 {dimension_numbers = #tpu.dot_dimension_numbers<[1], [0], [0], [1], [0, 0, 1, 1], [], []>} : vector<8x128xbf16>, vector<128x128xbf16>, vector<8x128xf32> -> vector<8x128xf32>
    %c0_9 = arith.constant 0 : index
    %c0_10 = arith.constant 0 : index
    %12 = vector.load %arg5[%c0_9, %c0_10] : memref<1x128xf32, #tpu.memory_space<vmem>>, vector<1x128xf32>
    %13 = vector.broadcast %12 : vector<1x128xf32> to vector<8x128xf32>
    %14 = arith.addf %11, %13 : vector<8x128xf32>
    %cst_11 = arith.constant 0.000000e+00 : f32
    %15 = vector.broadcast %cst_11 : f32 to vector<8x128xf32>
    %16 = arith.maximumf %14, %15 : vector<8x128xf32>
    %17 = arith.truncf %16 : vector<8x128xf32> to vector<8x128xbf16>
    %c0_12 = arith.constant 0 : index
    %c0_13 = arith.constant 0 : index
    %18 = vector.load %arg6[%c0_12, %c0_13] : memref<128x128xbf16, #tpu.memory_space<vmem>>, vector<128x128xbf16>
    %cst_14 = arith.constant dense<0.000000e+00> : vector<8x128xf32>
    %19 = tpu.matmul %17, %18, %cst_14 {dimension_numbers = #tpu.dot_dimension_numbers<[1], [0], [0], [1], [0, 0, 1, 1], [], []>} : vector<8x128xbf16>, vector<128x128xbf16>, vector<8x128xf32> -> vector<8x128xf32>
    %c0_15 = arith.constant 0 : index
    %c0_16 = arith.constant 0 : index
    %20 = vector.load %arg7[%c0_15, %c0_16] : memref<1x128xf32, #tpu.memory_space<vmem>>, vector<1x128xf32>
    %21 = vector.broadcast %20 : vector<1x128xf32> to vector<8x128xf32>
    %22 = arith.addf %19, %21 : vector<8x128xf32>
    %cst_17 = arith.constant 0.000000e+00 : f32
    %23 = vector.broadcast %cst_17 : f32 to vector<8x128xf32>
    %24 = arith.maximumf %22, %23 : vector<8x128xf32>
    %25 = arith.truncf %24 : vector<8x128xf32> to vector<8x128xbf16>
    %c0_18 = arith.constant 0 : index
    %c0_19 = arith.constant 0 : index
    %26 = vector.load %arg8[%c0_18, %c0_19] : memref<128x1xbf16, #tpu.memory_space<vmem>>, vector<128x1xbf16>
    %cst_20 = arith.constant dense<0.000000e+00> : vector<8x1xf32>
    %27 = tpu.matmul %25, %26, %cst_20 {dimension_numbers = #tpu.dot_dimension_numbers<[1], [0], [0], [1], [0, 0, 1, 1], [], []>} : vector<8x128xbf16>, vector<128x1xbf16>, vector<8x1xf32> -> vector<8x1xf32>
    %c0_21 = arith.constant 0 : index
    %c0_22 = arith.constant 0 : index
    %28 = memref.load %arg9[%c0_21, %c0_22] : memref<1x1xf32, #tpu.memory_space<smem>>
    %29 = vector.broadcast %28 : f32 to vector<8x1xf32>
    %30 = arith.addf %27, %29 : vector<8x1xf32>
    %31 = arith.negf %30 : vector<8x1xf32>
    %32 = math.exp %31 : vector<8x1xf32>
    %cst_23 = arith.constant 1.000000e+00 : f32
    %33 = vector.broadcast %cst_23 : f32 to vector<8x1xf32>
    %34 = arith.addf %33, %32 : vector<8x1xf32>
    %35 = arith.divf %33, %34 : vector<8x1xf32>
    %c0_24 = arith.constant 0 : index
    %c0_25 = arith.constant 0 : index
    %36 = vector.load %arg10[%c0_24, %c0_25] : memref<8x1xf32, #tpu.memory_space<vmem>>, vector<8x1xf32>
    tpu.vector_store %arg10[%c0_24, %c0_25], %35 {strides = array<i32>} : memref<8x1xf32, #tpu.memory_space<vmem>>, vector<8x1xf32>,
    return
  }
  func.func @transform_0(%arg0: i32) -> (i32, i32) {
    %c0_i32 = arith.constant 0 : i32
    %c0_i32_0 = arith.constant 0 : i32
    return %arg0, %c0_i32 : i32, i32
  }
  func.func @transform_1(%arg0: i32) -> (i32, i32) {
    %c0_i32 = arith.constant 0 : i32
    %c0_i32_0 = arith.constant 0 : i32
    %c0_i32_1 = arith.constant 0 : i32
    return %c0_i32, %c0_i32_0 : i32, i32
  }
  func.func @transform_2(%arg0: i32) -> (i32, i32) {
    %c0_i32 = arith.constant 0 : i32
    %c0_i32_0 = arith.constant 0 : i32
    %c0_i32_1 = arith.constant 0 : i32
    return %c0_i32, %c0_i32_0 : i32, i32
  }
  func.func @transform_3(%arg0: i32) -> (i32, i32) {
    %c0_i32 = arith.constant 0 : i32
    %c0_i32_0 = arith.constant 0 : i32
    %c0_i32_1 = arith.constant 0 : i32
    return %c0_i32, %c0_i32_0 : i32, i32
  }
  func.func @transform_4(%arg0: i32) -> (i32, i32) {
    %c0_i32 = arith.constant 0 : i32
    %c0_i32_0 = arith.constant 0 : i32
    %c0_i32_1 = arith.constant 0 : i32
    return %c0_i32, %c0_i32_0 : i32, i32
  }
  func.func @transform_5(%arg0: i32) -> (i32, i32) {
    %c0_i32 = arith.constant 0 : i32
    %c0_i32_0 = arith.constant 0 : i32
    %c0_i32_1 = arith.constant 0 : i32
    return %c0_i32, %c0_i32_0 : i32, i32
  }
  func.func @transform_6(%arg0: i32) -> (i32, i32) {
    %c0_i32 = arith.constant 0 : i32
    %c0_i32_0 = arith.constant 0 : i32
    %c0_i32_1 = arith.constant 0 : i32
    return %c0_i32, %c0_i32_0 : i32, i32
  }
  func.func @transform_7(%arg0: i32) -> (i32, i32) {
    %c0_i32 = arith.constant 0 : i32
    %c0_i32_0 = arith.constant 0 : i32
    %c0_i32_1 = arith.constant 0 : i32
    return %c0_i32, %c0_i32_0 : i32, i32
  }
  func.func @transform_8(%arg0: i32) -> (i32, i32) {
    %c0_i32 = arith.constant 0 : i32
    %c0_i32_0 = arith.constant 0 : i32
    %c0_i32_1 = arith.constant 0 : i32
    return %c0_i32, %c0_i32_0 : i32, i32
  }
  func.func @transform_9(%arg0: i32) -> (i32, i32) {
    %c0_i32 = arith.constant 0 : i32
    %c0_i32_0 = arith.constant 0 : i32
    return %arg0, %c0_i32 : i32, i32
  }
}

</mosaic_0001>

<bundles_post_ra>
// kernel: tpu_custom_call.1
= control target key start
LH: loop header
LB: loop body
LE: loop exit
PB: predicated region body
PF: predicated region fallthrough
CT: control target
= control target key end

     0   :  { %15 = vsyncpa [#allocation4], 0  ;;  %s739_s0 = inlined_call_operand.hbm [shape: f32[8,32], index: 0, kind: input, shape index: {}]   ;;  %s740_s1 = inlined_call_operand.hbm [shape: bf16[32,128], index: 1, kind: input, shape index: {}]   ;;  %s741_s2 = inlined_call_operand.vmem [shape: f32[1,128], index: 2, kind: input, shape index: {}]   ;;  %s742_s3 = inlined_call_operand.vmem [shape: bf16[128,128], index: 3, kind: input, shape index: {}]   ;;  %s743_s4 = inlined_call_operand.vmem [shape: f32[1,128], index: 4, kind: input, shape index: {}]   ;;  %s744_s5 = inlined_call_operand.hbm [shape: bf16[128,128], index: 5, kind: input, shape index: {}]   ;;  %s745_s6 = inlined_call_operand.vmem [shape: f32[1,128], index: 6, kind: input, shape index: {}]   ;;  %s746_s7 = inlined_call_operand.vmem [shape: bf16[128,1], index: 7, kind: input, shape index: {}]   ;;  %s747_s8 = inlined_call_operand.<no memory space> [shape: f32[1,1], index: 8, kind: input, shape index: {}]   ;;  %s748_s9 = inlined_call_operand.vmem [shape: f32[8,1], index: 9, kind: output, shape index: {}]  }
   0x1   :  { %16 = vsyncpa [#allocation6], 0  ;;  %s32_s11 = sshll.u32 %s740_s1, 4  ;;  %s612_s12 = smov [#allocation5]   ;;  %s33_s11 = int_to_ptr.hbm [resolvable:$true] %s32_s11 }
   0x2   :  { %s34_s13 = sshll.u32 %s612_s12, 4  ;;  %s22_s16 = sshll.u32 %s739_s0, 4  ;;  %s35_s13 = int_to_ptr.vmem [resolvable:$true] %s34_s13  ;;  %s23_s16 = int_to_ptr.hbm [resolvable:$true] %s22_s16 }
   0x3   :  { %s613_s17 = smov 64   ;;  %s614_s18 = smov 4  }
   0x4   :  { %40 = dma.hbm_to_vmem [thread:$0]  %s33_s11, 256, %s35_s13, [#allocation6], %s613_s17, %s613_s17, %s614_s18  }
   0x5   :  { %s615_s19 = smov [#allocation3]   ;;  %s51_s23 = sshll.u32 %s744_s5, 4  ;;  %s52_s23 = int_to_ptr.hbm [resolvable:$true] %s51_s23 }
   0x6   :  { %s24_s20 = sshll.u32 %s615_s19, 4  ;;  %s616_s1 = smov [#allocation7]   ;;  %s25_s20 = int_to_ptr.vmem [resolvable:$true] %s24_s20 }
   0x7   :  { %27 = dma.hbm_to_vmem [thread:$0]  %s23_s16, 128, %s25_s20, [#allocation4]  }
   0x8   :  { %s53_s24 = sshll.u32 %s616_s1, 4  ;;  %s54_s24 = int_to_ptr.vmem [resolvable:$true] %s53_s24 }
   0x9   :  { %59 = dma.hbm_to_vmem [thread:$0]  %s52_s23, 1024, %s54_s24, [#allocation6], %s613_s17, %s613_s17, %s614_s18  }
   0xa   :  { %608 = dma.done.wait [#allocation4], 128  }
   0xb   :  { %609 = vsyncadd [#allocation4], 4294967168 }
   0xc   :  { %610 = dma.done.wait [#allocation6], 1280  }
   0xd   :  { %611 = vsyncadd [#allocation6], 4294966016  ;;  %v499_v0 = vld [vmem:[#allocation5 + $0x8] sm:$0xff]  ;;  %v507_v1 = vld [vmem:[%s742_s3 + $0x38] sm:$0xff]  ;;  %vm101_vm0 = vcmask 261120   ;;  %v303_v46 = vstv %s747_s8  ;;  %vm384_vm4 = vcmask 7168  }
   0xe   :  { %111 = vmatpush.bf16.msra.mxu0 %v499_v0  ;;  %v498_v2 = vld [vmem:[#allocation5] sm:$0xff]  ;;  %v79_v3 = vld [vmem:[#allocation3] sm:$0xff]  ;;  %188 = vmatpush.bf16.msra.mxu1 %v507_v1  ;;  %v506_v4 = vld [vmem:[%s742_s3 + $0x30] sm:$0xff] }
   0xf   :  { %v80_v5 = vpack.c.bf16 %v79_v3, %v79_v3  ;;  %v505_v6 = vld [vmem:[%s742_s3 + $0x28] sm:$0xff]  ;;  %v504_v7 = vld [vmem:[%s742_s3 + $0x20] sm:$0xff]  ;;  %v503_v8 = vld [vmem:[%s742_s3 + $0x18] sm:$0xff] }
  0x10   :  { %v502_v9 = vld [vmem:[%s742_s3 + $0x10] sm:$0xff]  ;;  %v501_v10 = vld [vmem:[%s742_s3 + $0x8] sm:$0xff]  ;;  %v500_v11 = vld [vmem:[%s742_s3] sm:$0xff] }
  0x11   :  { %v515_v12 = vld [vmem:[#allocation7 + $0x38] sm:$0xff]  ;;  %v514_v13 = vld [vmem:[#allocation7 + $0x30] sm:$0xff]  ;;  %v513_v14 = vld [vmem:[#allocation7 + $0x28] sm:$0xff] }
  0x12   :  { %112 = vmatpush.bf16.msra.mxu0 %v498_v2  ;;  %189 = vmatpush.bf16.msra.mxu1 %v506_v4  ;;  %v512_v15 = vld [vmem:[#allocation7 + $0x20] sm:$0xff]  ;;  %v511_v16 = vld [vmem:[#allocation7 + $0x18] sm:$0xff]  ;;  %v510_v17 = vld [vmem:[#allocation7 + $0x10] sm:$0xff] }
  0x13   :  { %271 = vmatpush.bf16.msra.mxu2 %v515_v12  ;;  %v529_v18 = vld [vmem:[%s741_s2] ss:$0 sm:$0xff]  ;;  %v508_v25 = vld [vmem:[#allocation7] sm:$0xff]  ;;  %v522_v27 = vld [vmem:[%s746_s7 + $0x30] sm:$0xff] }
  0x14   :  { %v509_v24 = vld [vmem:[#allocation7 + $0x8] sm:$0xff]  ;;  %v523_v26 = vld [vmem:[%s746_s7 + $0x38] sm:$0xff]  ;;  %v521_v28 = vld [vmem:[%s746_s7 + $0x28] sm:$0xff] }
  0x15   :  { %400 = vmatmul.msk.bf16.vlgmr.msra.gmra.mxu0 %vm101_vm0, %v80_v5  ;;  %352 = vmatpush.bf16.msra.mxu3 %v523_v26  ;;  %v520_v29 = vld [vmem:[%s746_s7 + $0x20] sm:$0xff]  ;;  %v519_v30 = vld [vmem:[%s746_s7 + $0x18] sm:$0xff]  ;;  %v518_v31 = vld [vmem:[%s746_s7 + $0x10] sm:$0xff] }
  0x16   :  { %190 = vmatpush.bf16.msra.mxu1 %v505_v6  ;;  %v530_v32 = vld [vmem:[%s743_s4] ss:$0 sm:$0xff]  ;;  %v517_v38 = vld [vmem:[%s746_s7 + $0x8] sm:$0xff] }
  0x17   :  { %272 = vmatpush.bf16.msra.mxu2 %v514_v13  ;;  %v516_v39 = vld [vmem:[%s746_s7] sm:$0xff] }
  0x18   :  { %v531_v40 = vld [vmem:[%s745_s6] ss:$0 sm:$0xff] }
  0x19   :  { %353 = vmatpush.bf16.msra.mxu3 %v522_v27 }
  0x1a   :  { %191 = vmatpush.bf16.msra.mxu1 %v504_v7 }
  0x1b   :  { %273 = vmatpush.bf16.msra.mxu2 %v513_v14 }
  0x1d   :  { %354 = vmatpush.bf16.msra.mxu3 %v521_v28 }
  0x1e   :  { %192 = vmatpush.bf16.msra.mxu1 %v503_v8 }
  0x1f   :  { %274 = vmatpush.bf16.msra.mxu2 %v512_v15 }
  0x21   :  { %355 = vmatpush.bf16.msra.mxu3 %v520_v29 }
  0x22   :  { %193 = vmatpush.bf16.msra.mxu1 %v502_v9 }
  0x23   :  { %275 = vmatpush.bf16.msra.mxu2 %v511_v16 }
  0x25   :  { %356 = vmatpush.bf16.msra.mxu3 %v519_v30 }
  0x26   :  { %194 = vmatpush.bf16.msra.mxu1 %v501_v10 }
  0x27   :  { %276 = vmatpush.bf16.msra.mxu2 %v510_v17 }
  0x29   :  { %357 = vmatpush.bf16.msra.mxu3 %v518_v31 }
  0x2a   :  { %195 = vmatpush.bf16.msra.mxu1 %v500_v11 }
  0x2b   :  { %277 = vmatpush.bf16.msra.mxu2 %v509_v24 }
  0x2d   :  { %358 = vmatpush.bf16.msra.mxu3 %v517_v38 }
  0x2f   :  { %278 = vmatpush.bf16.msra.mxu2 %v508_v25 }
  0x31   :  { %359 = vmatpush.bf16.msra.mxu3 %v516_v39 }
  0x92   :  { %v114_v19 = vpop.f32.mrf.mxu0 }
  0x93   :  { %v115_v20 = vadd.f32 %v529_v18, %v114_v19 }
  0x95   :  { %v118_v21 = vmax.f32 %v115_v20, 0.0 }
  0x97   :  { %v119_v22 = vpack.c.bf16 %v118_v21, %v118_v21 }
  0x99   :  { %196 = vmatmul.bf16.vlgmr.msra.gmra.mxu1 %v119_v22 }
  0x9a   :  { %v116_v23 = vpop.f32.mrf.mxu0 }
 0x116   :  { %v197_v33 = vpop.f32.mrf.mxu1 }
 0x117   :  { %v198_v34 = vadd.f32 %v530_v32, %v197_v33 }
 0x119   :  { %v201_v35 = vmax.f32 %v198_v34, 0.0 }
 0x11b   :  { %v202_v36 = vpack.c.bf16 %v201_v35, %v201_v35 }
 0x11d   :  { %279 = vmatmul.bf16.vlgmr.msra.gmra.mxu2 %v202_v36 }
 0x11e   :  { %v199_v37 = vpop.f32.mrf.mxu1 }
 0x1a0   :  { %v280_v41 = vpop.f32.mrf.mxu2 }
 0x1a1   :  { %v281_v42 = vadd.f32 %v531_v40, %v280_v41 }
 0x1a3   :  { %v284_v43 = vmax.f32 %v281_v42, 0.0 }
 0x1a5   :  { %v285_v44 = vpack.c.bf16 %v284_v43, %v284_v43 }
 0x1a7   :  { %360 = vmatmul.bf16.vlgmr.msra.gmra.mxu3 %v285_v44 }
 0x1a8   :  { %v282_v45 = vpop.f32.mrf.mxu2 }
 0x22a   :  { %v361_v47 = vpop.f32.mrf.mxu3 }
 0x22b   :  { %v362_v48 = vadd.f32 %v361_v47, %v303_v46 }
 0x22d   :  { %v497_v49 = vmul.f32 -1.442695, %v362_v48 }
 0x22f   :  { %532 = vpow2.f32 %v497_v49 }
 0x232   :  { %v363_v50 = vpop.f32.mrf.mxu3 }
 0x235   :  { %v533_v51 = vpop.eup %532 }
 0x236   :  { %v368_v52 = vadd.f32 1.0, %v533_v51 }
 0x238   :  { %534 = vrcp.f32 %v368_v52  ;;  %v380_v56 = vand.u32 2147483648, %v368_v52  ;;  %v378_v58 = vand.u32 2147483647, %v368_v52  ;;  %vm374_vm2 = vweird.f32 %v368_v52 }
 0x23a   :  { %v381_v60 = vor.u32 1.1754944e-38, %v380_v56  ;;  %vm379_vm5 = vcmp.eq.f32.partialorder %v378_v58, 8.507059e+37 }
 0x23e   :  { %v535_v53 = vpop.eup %534 }
 0x23f   :  { %v370_v54 = vmul.f32 %v535_v53, %v368_v52  ;;  %vm375_vm1 = vweird.f32 %v535_v53 }
 0x240   :  { %vm376_vm3 = vmor %vm374_vm2, %vm375_vm1 }
 0x241   :  { %v371_v55 = vsub.f32 1.0, %v370_v54 }
 0x243   :  { %v372_v57 = vmul.f32 %v535_v53, %v371_v55 }
 0x245   :  { %v373_v59 = vadd.f32 %v535_v53, %v372_v57 }
 0x247   :  { %v377_v61 = vsel %vm376_vm3, %v535_v53, %v373_v59 }
 0x248   :  { %v382_v62 = vsel %vm379_vm5, %v381_v60, %v377_v61 }
 0x249   :  { %385 = vst.msk [vmem:[%s748_s9] sm:$0xff] %vm384_vm4, %v382_v62 }
 0x24a   :  { %390 = vsyncpa [#allocation4], 1 }
 0x24b   :  { %391 = vsyncpa [#allocation6], 1 }

</bundles_post_ra>
